<compile_context>
chip_gen: v7x
topology: tpu7x:2x2x1
jax: 0.10.0
libtpu: 0.0.40
codegen_flags: <defaults>
</compile_context>

<pallas_src>
import functools

import jax
import jax.numpy as jnp
from jax.experimental import pallas as pl
from jax.experimental.pallas import tpu as pltpu


# ----------------------------- kernels --------------------------------------

def _ffn_resident_kernel(x_ref, w1_ref, b1_ref, w2_ref, b2_ref, o_ref, *, compute_dtype):
    # Whole W1/W2 live in VMEM (constant index_map -> fetched once, reused for all
    # row tiles). Single fused Linear->ReLU->Linear, no reduction axis.
    x = x_ref[...].astype(compute_dtype)
    h = jnp.dot(x, w1_ref[...].astype(compute_dtype), preferred_element_type=jnp.float32)
    h = jnp.maximum(h + b1_ref[...], 0.0)
    out = jnp.dot(h.astype(compute_dtype), w2_ref[...].astype(compute_dtype),
                  preferred_element_type=jnp.float32)
    o_ref[...] = (out + b2_ref[...]).astype(o_ref.dtype)


def _ffn_ktiled_f32out_kernel(x_ref, w1_ref, b1_ref, w2_ref, b2_ref, o_ref, *, compute_dtype):
    # d_ff tiled as reduction axis k. Output dtype is f32, so accumulate directly into
    # o_ref (resident across k: its index_map ignores k). No scratch, no zero-init.
    k = pl.program_id(1)
    x = x_ref[...].astype(compute_dtype)
    h = jnp.dot(x, w1_ref[...].astype(compute_dtype), preferred_element_type=jnp.float32)
    h = jnp.maximum(h + b1_ref[...], 0.0)
    partial = jnp.dot(h.astype(compute_dtype), w2_ref[...].astype(compute_dtype),
                      preferred_element_type=jnp.float32)

    @pl.when(k == 0)
    def _():
        o_ref[...] = partial + b2_ref[...]      # b2 added exactly once

    @pl.when(k != 0)
    def _():
        o_ref[...] += partial


def _ffn_ktiled_scratch_kernel(x_ref, w1_ref, b1_ref, w2_ref, b2_ref, o_ref, acc_ref,
                               *, compute_dtype):
    # Same as above but the output dtype is narrower than f32 -> f32 VMEM accumulator,
    # single downcast at finalize.
    k = pl.program_id(1)
    x = x_ref[...].astype(compute_dtype)
    h = jnp.dot(x, w1_ref[...].astype(compute_dtype), preferred_element_type=jnp.float32)
    h = jnp.maximum(h + b1_ref[...], 0.0)
    partial = jnp.dot(h.astype(compute_dtype), w2_ref[...].astype(compute_dtype),
                      preferred_element_type=jnp.float32)

    @pl.when(k == 0)
    def _():
        acc_ref[...] = partial                  # write first partial directly

    @pl.when(k != 0)
    def _():
        acc_ref[...] += partial

    @pl.when(k == pl.num_programs(1) - 1)
    def _():
        o_ref[...] = (acc_ref[...] + b2_ref[...]).astype(o_ref.dtype)


# ----------------------------- tiling heuristics -----------------------------

def _round_up(x, m):
    return ((x + m - 1) // m) * m


def _tpu_generation_defaults():
    """Per-generation tile / VMEM defaults (v6e: tm=512/tk=512, v7x: tm=512/tk=256 with
    a 56 MiB scoped limit and 2 cores, v5e: tm=256/tk=1024)."""
    kind = ""
    try:
        kind = jax.devices()[0].device_kind.lower()
    except Exception:
        pass
    if ("v5e" in kind) or ("v5 lite" in kind) or ("v5litepod" in kind):
        return dict(tm=256, tk=1024, vmem_limit=96 * 1024 * 1024, cores=1)
    if ("v6" in kind) or ("trillium" in kind):
        return dict(tm=512, tk=512, vmem_limit=96 * 1024 * 1024, cores=1)
    if "v7" in kind:
        return dict(tm=512, tk=256, vmem_limit=56 * 1024 * 1024, cores=2)
    return dict(tm=512, tk=512, vmem_limit=64 * 1024 * 1024, cores=1)


def _pick_tm(M, tm_target, cores):
    tm = min(tm_target, _round_up(M, 16))
    tm = max(16, (tm // 16) * 16)
    # Don't burn a big fraction of MXU work on pad rows (e.g. M=272 -> tm=512 is bad).
    while tm > 16 and (_round_up(M, tm) - M) > _round_up(M, tm) // 3:
        tm = max(16, (tm // 2 // 16) * 16)
    # v7x: the "parallel" row axis shards across 2 TensorCores; avoid a single tile.
    while cores > 1 and (_round_up(M, tm) // tm) < cores and tm >= 32:
        tm = max(16, (tm // 2 // 16) * 16)
    return tm


def _tk_candidates(d_ff, tk_target):
    # Multiple-of-128 divisors of d_ff (lane-aligned W1 slab, exact decomposition).
    cands = [d for d in range(128, d_ff + 1, 128) if d_ff % d == 0 and d <= tk_target]
    return sorted(cands, reverse=True)


def _resident_vmem_bytes(tm, d_model, d_ff, x_isz, w_isz, out_isz, c_isz):
    est = 2 * 2 * d_model * d_ff * w_isz            # W1 + W2 (conservatively x2-buffered)
    est += 2 * (d_ff + d_model) * 4                 # biases
    est += 2 * tm * d_model * x_isz                 # x row tile (double-buffered)
    est += 2 * tm * d_model * out_isz               # out row tile
    est += tm * d_ff * 4 + tm * d_ff * c_isz        # h (f32) + h cast for 2nd matmul
    est += tm * d_model * 4                         # f32 result before downcast
    if w_isz != c_isz:
        est += 2 * d_model * d_ff * c_isz           # in-kernel weight-cast temporaries
    if x_isz != c_isz:
        est += tm * d_model * c_isz
    return est


def _ktiled_vmem_bytes(tm, tk, d_model, x_isz, w_isz, out_isz, use_scratch, c_isz):
    est = 2 * d_model * tk * w_isz                  # W1 slab (double-buffered)
    est += 2 * tk * d_model * w_isz                 # W2 slab
    est += 2 * (tk + d_model) * 4                   # bias slabs
    est += 2 * tm * d_model * x_isz                 # x row tile
    est += 2 * tm * d_model * out_isz               # out row tile
    if use_scratch:
        est += tm * d_model * 4                     # f32 accumulator
    est += tm * tk * 4 + tm * tk * c_isz            # h (f32) + h cast
    if w_isz != c_isz:
        est += 2 * d_model * tk * c_isz
    if x_isz != c_isz:
        est += tm * d_model * c_isz
    return est


# ----------------------------- host wrapper ----------------------------------

def prepare_ffn_params(w1, b1, w2, b2, *, weight_dtype=jnp.bfloat16):
    """Cast weights to the at-rest MXU dtype ONCE (outside the per-call path).
    Biases stay f32 (added in f32 inside the kernel)."""
    return (w1.astype(weight_dtype), b1.astype(jnp.float32),
            w2.astype(weight_dtype), b2.astype(jnp.float32))


def feed_forward(x, w1, b1, w2, b2, *, tm=None, tk=None, force_path=None,
                 compute_dtype=jnp.bfloat16):
    """x: (..., d_model) -> (..., d_model).  w1: (d_model, d_ff), w2: (d_ff, d_model)."""
    assert force_path in (None, "resident", "ktiled")
    orig_shape = x.shape
    d_model = x.shape[-1]
    d_ff = w1.shape[1]
    assert w1.shape == (d_model, d_ff) and w2.shape == (d_ff, d_model)

    M = 1
    for s in orig_shape[:-1]:
        M *= s
    x2 = x.reshape(M, d_model)

    cfg = _tpu_generation_defaults()
    tm_target = tm if tm is not None else cfg["tm"]
    tk_target = tk if tk is not None else cfg["tk"]
    vmem_limit = cfg["vmem_limit"]
    budget = int(vmem_limit * 0.85)

    out_dtype = x.dtype
    x_isz = jnp.dtype(x.dtype).itemsize
    w_isz = jnp.dtype(w1.dtype).itemsize
    out_isz = jnp.dtype(out_dtype).itemsize
    c_isz = jnp.dtype(compute_dtype).itemsize

    # Biases: tiny, reshape/cast cost negligible.
    b1_2 = b1.reshape(1, d_ff).astype(jnp.float32)
    b2_2 = b2.reshape(1, d_model).astype(jnp.float32)

    tm_sel = _pick_tm(M, tm_target, cfg["cores"])

    # ---- path selection ------------------------------------------------------
    if force_path is not None:
        path = force_path
    else:
        path = ("resident"
                if _resident_vmem_bytes(tm_sel, d_model, d_ff, x_isz, w_isz, out_isz, c_isz)
                <= budget else "ktiled")

    if path == "resident":
        kernel = functools.partial(_ffn_resident_kernel, compute_dtype=compute_dtype)
        tk_sel = d_ff
        nk = 1
        grid_uses_k = False
        use_scratch = False
    else:
        use_scratch = (out_dtype != jnp.float32)
        cands = _tk_candidates(d_ff, tk_target)
        if not cands:
            # No multiple-of-128 divisor <= target: use the full d_ff (lane dim == array
            # dim is always legal). Only hit for small / odd d_ff.
            cands = [d_ff]
        tk_sel = cands[-1]
        for c in cands:  # descending: biggest slab that fits the VMEM budget
            if _ktiled_vmem_bytes(tm_sel, c, d_model, x_isz, w_isz, out_isz,
                                  use_scratch, c_isz) <= budget:
                tk_sel = c
                break
        while (_ktiled_vmem_bytes(tm_sel, tk_sel, d_model, x_isz, w_isz, out_isz,
                                  use_scratch, c_isz) > budget and tm_sel > 16):
            tm_sel = max(16, (tm_sel // 2 // 16) * 16)
        nk = d_ff // tk_sel
        grid_uses_k = True
        if use_scratch:
            kernel = functools.partial(_ffn_ktiled_scratch_kernel, compute_dtype=compute_dtype)
        else:
            kernel = functools.partial(_ffn_ktiled_f32out_kernel, compute_dtype=compute_dtype)

    # ---- row padding (only the minimal amount; tm was chosen to keep waste small) ----
    M_pad = _round_up(M, tm_sel)
    if M_pad != M:
        # TODO(synk): mask the ragged last row tile in-kernel instead of padding here.
        x2 = jnp.pad(x2, ((0, M_pad - M), (0, 0)))
    n_rows = M_pad // tm_sel

    # ---- specs ---------------------------------------------------------------
    if grid_uses_k:
        grid = (n_rows, nk)
        in_specs = [
            pl.BlockSpec((tm_sel, d_model), lambda i, k: (i, 0)),   # x row tile (resident over k)
            pl.BlockSpec((d_model, tk_sel), lambda i, k: (0, k)),   # W1 slab
            pl.BlockSpec((1, tk_sel),       lambda i, k: (0, k)),   # b1 slab
            pl.BlockSpec((tk_sel, d_model), lambda i, k: (k, 0)),   # W2 slab
            pl.BlockSpec((1, d_model),      lambda i, k: (0, 0)),   # b2 (grid-invariant)
        ]
        out_spec = pl.BlockSpec((tm_sel, d_model), lambda i, k: (i, 0))
        scratch = [pltpu.VMEM((tm_sel, d_model), jnp.float32)] if use_scratch else []
        dims = ("parallel", "arbitrary")
    else:
        grid = (n_rows,)
        in_specs = [
            pl.BlockSpec((tm_sel, d_model), lambda i: (i, 0)),      # x row tile
            pl.BlockSpec((d_model, d_ff),   lambda i: (0, 0)),      # W1 fully resident
            pl.BlockSpec((1, d_ff),         lambda i: (0, 0)),      # b1
            pl.BlockSpec((d_ff, d_model),   lambda i: (0, 0)),      # W2 fully resident
            pl.BlockSpec((1, d_model),      lambda i: (0, 0)),      # b2
        ]
        out_spec = pl.BlockSpec((tm_sel, d_model), lambda i: (i, 0))
        scratch = []
        dims = ("parallel",)

    out = pl.pallas_call(
        kernel,
        out_shape=jax.ShapeDtypeStruct((M_pad, d_model), out_dtype),
        grid_spec=pltpu.PrefetchScalarGridSpec(
            num_scalar_prefetch=0,
            grid=grid,
            in_specs=in_specs,
            out_specs=out_spec,
            scratch_shapes=scratch,
        ),
        compiler_params=pltpu.CompilerParams(
            dimension_semantics=dims,
            vmem_limit_bytes=vmem_limit,
        ),
    )(x2, w1, b1_2, w2, b2_2)

    if M_pad != M:
        out = out[:M]
    return out.reshape(orig_shape)


# ----------------------------- init + test -----------------------------------

def init_params(key, d_model, d_ff):
    """Weights ~ N(0, 0.001^2) (matching nn.init.normal(std=0.001));
    biases use nn.Linear's default U(-1/sqrt(fan_in), 1/sqrt(fan_in))."""
    k1, k2, k3, k4 = jax.random.split(key, 4)
    w1 = (0.001 * jax.random.normal(k1, (d_model, d_ff))).astype(jnp.float32)
    w2 = (0.001 * jax.random.normal(k2, (d_ff, d_model))).astype(jnp.float32)
    bound1 = 1.0 / (d_model ** 0.5)
    bound2 = 1.0 / (d_ff ** 0.5)
    b1 = jax.random.uniform(k3, (d_ff,), minval=-bound1, maxval=bound1).astype(jnp.float32)
    b2 = jax.random.uniform(k4, (d_model,), minval=-bound2, maxval=bound2).astype(jnp.float32)
    return w1, b1, w2, b2


if __name__ == "__main__":
    B, S = 2, 8
    d_model, d_ff = 128, 256   # small, tile-friendly shapes consistent with the module

    key = jax.random.PRNGKey(0)
    kx, kp = jax.random.split(key)
    x = jax.random.normal(kx, (B, S, d_model), dtype=jnp.float32)
    w1_f32, b1_f32, w2_f32, b2_f32 = init_params(kp, d_model, d_ff)

    # bf16-at-rest weights: cast ONCE here, never per call.
    w1, b1, w2, b2 = prepare_ffn_params(w1_f32, b1_f32, w2_f32, b2_f32)

    # Pure-JAX f32 reference (kernel does bf16 MXU matmuls -> looser tolerance).
    ref = jnp.maximum(x @ w1_f32 + b1_f32, 0.0) @ w2_f32 + b2_f32

    # 1) Default path: at these sizes the weights are fully VMEM-resident (rows-only grid).
    out = jax.block_until_ready(feed_forward(x, w1, b1, w2, b2))
    assert out.shape == x.shape
    assert jnp.allclose(out, ref, atol=3e-3, rtol=2e-2), float(jnp.max(jnp.abs(out - ref)))

    # 2) Force the d_ff-tiled reduction path with nk=2 (f32 out -> accumulate into o_ref).
    out_kt = jax.block_until_ready(
        feed_forward(x, w1, b1, w2, b2, tk=128, force_path="ktiled"))
    assert jnp.allclose(out_kt, ref, atol=3e-3, rtol=2e-2), float(jnp.max(jnp.abs(out_kt - ref)))

    # 3) bf16 activations -> exercises the f32-scratch accumulator variant + bf16 output.
    out_bf = jax.block_until_ready(
        feed_forward(x.astype(jnp.bfloat16), w1, b1, w2, b2, tk=128, force_path="ktiled"))
    assert out_bf.dtype == jnp.bfloat16
    assert jnp.allclose(out_bf.astype(jnp.float32), ref, atol=1e-2, rtol=5e-2), \
        float(jnp.max(jnp.abs(out_bf.astype(jnp.float32) - ref)))

    print("KERNEL_OK")
</pallas_src>

<mosaic_0001>
module attributes {stable_mosaic.version = 11 : i64} {
  func.func @_ffn_resident_kernel(%arg0: i32, %arg1: memref<16x128xf32, #tpu.memory_space<vmem>>, %arg2: memref<128x256xbf16, #tpu.memory_space<vmem>>, %arg3: memref<1x256xf32, #tpu.memory_space<vmem>>, %arg4: memref<256x128xbf16, #tpu.memory_space<vmem>>, %arg5: memref<1x128xf32, #tpu.memory_space<vmem>>, %arg6: memref<16x128xf32, #tpu.memory_space<vmem>>) attributes {dimension_semantics = [#tpu.dimension_semantics<parallel>], iteration_bounds = array<i64: 1>, scalar_prefetch = 0 : i64, scratch_operands = 0 : i64, tpu.core_type = #tpu.core_type<tc>, window_params = [{transform_indices = @transform_0, window_bounds = array<i64: 16, 128>}, {pipeline_mode = #tpu.pipeline_mode<synchronous>, transform_indices = @transform_1, window_bounds = array<i64: 128, 256>}, {pipeline_mode = #tpu.pipeline_mode<synchronous>, transform_indices = @transform_2, window_bounds = array<i64: 1, 256>}, {pipeline_mode = #tpu.pipeline_mode<synchronous>, transform_indices = @transform_3, window_bounds = array<i64: 256, 128>}, {pipeline_mode = #tpu.pipeline_mode<synchronous>, transform_indices = @transform_4, window_bounds = array<i64: 1, 128>}, {transform_indices = @transform_5, window_bounds = array<i64: 16, 128>}]} {
    %c0 = arith.constant 0 : index
    %c0_0 = arith.constant 0 : index
    %0 = vector.load %arg1[%c0, %c0_0] : memref<16x128xf32, #tpu.memory_space<vmem>>, vector<16x128xf32>
    %1 = arith.truncf %0 : vector<16x128xf32> to vector<16x128xbf16>
    %c0_1 = arith.constant 0 : index
    %c0_2 = arith.constant 0 : index
    %2 = vector.load %arg2[%c0_1, %c0_2] : memref<128x256xbf16, #tpu.memory_space<vmem>>, vector<128x256xbf16>
    %cst = arith.constant dense<0.000000e+00> : vector<16x256xf32>
    %3 = tpu.matmul %1, %2, %cst {dimension_numbers = #tpu.dot_dimension_numbers<[1], [0], [0], [1], [0, 0, 1, 1], [], []>} : vector<16x128xbf16>, vector<128x256xbf16>, vector<16x256xf32> -> vector<16x256xf32>
    %c0_3 = arith.constant 0 : index
    %c0_4 = arith.constant 0 : index
    %4 = vector.load %arg3[%c0_3, %c0_4] : memref<1x256xf32, #tpu.memory_space<vmem>>, vector<1x256xf32>
    %5 = vector.broadcast %4 : vector<1x256xf32> to vector<16x256xf32>
    %6 = arith.addf %3, %5 : vector<16x256xf32>
    %cst_5 = arith.constant 0.000000e+00 : f32
    %7 = vector.broadcast %cst_5 : f32 to vector<16x256xf32>
    %8 = arith.maximumf %6, %7 : vector<16x256xf32>
    %9 = arith.truncf %8 : vector<16x256xf32> to vector<16x256xbf16>
    %c0_6 = arith.constant 0 : index
    %c0_7 = arith.constant 0 : index
    %10 = vector.load %arg4[%c0_6, %c0_7] : memref<256x128xbf16, #tpu.memory_space<vmem>>, vector<256x128xbf16>
    %cst_8 = arith.constant dense<0.000000e+00> : vector<16x128xf32>
    %11 = tpu.matmul %9, %10, %cst_8 {dimension_numbers = #tpu.dot_dimension_numbers<[1], [0], [0], [1], [0, 0, 1, 1], [], []>} : vector<16x256xbf16>, vector<256x128xbf16>, vector<16x128xf32> -> vector<16x128xf32>
    %c0_9 = arith.constant 0 : index
    %c0_10 = arith.constant 0 : index
    %12 = vector.load %arg5[%c0_9, %c0_10] : memref<1x128xf32, #tpu.memory_space<vmem>>, vector<1x128xf32>
    %13 = vector.broadcast %12 : vector<1x128xf32> to vector<16x128xf32>
    %14 = arith.addf %11, %13 : vector<16x128xf32>
    %c0_11 = arith.constant 0 : index
    %c0_12 = arith.constant 0 : index
    %15 = vector.load %arg6[%c0_11, %c0_12] : memref<16x128xf32, #tpu.memory_space<vmem>>, vector<16x128xf32>
    tpu.vector_store %arg6[%c0_11, %c0_12], %14 {strides = array<i32>} : memref<16x128xf32, #tpu.memory_space<vmem>>, vector<16x128xf32>,
    return
  }
  func.func @transform_0(%arg0: i32) -> (i32, i32) {
    %c0_i32 = arith.constant 0 : i32
    %c0_i32_0 = arith.constant 0 : i32
    return %arg0, %c0_i32 : i32, i32
  }
  func.func @transform_1(%arg0: i32) -> (i32, i32) {
    %c0_i32 = arith.constant 0 : i32
    %c0_i32_0 = arith.constant 0 : i32
    %c0_i32_1 = arith.constant 0 : i32
    return %c0_i32, %c0_i32_0 : i32, i32
  }
  func.func @transform_2(%arg0: i32) -> (i32, i32) {
    %c0_i32 = arith.constant 0 : i32
    %c0_i32_0 = arith.constant 0 : i32
    %c0_i32_1 = arith.constant 0 : i32
    return %c0_i32, %c0_i32_0 : i32, i32
  }
  func.func @transform_3(%arg0: i32) -> (i32, i32) {
    %c0_i32 = arith.constant 0 : i32
    %c0_i32_0 = arith.constant 0 : i32
    %c0_i32_1 = arith.constant 0 : i32
    return %c0_i32, %c0_i32_0 : i32, i32
  }
  func.func @transform_4(%arg0: i32) -> (i32, i32) {
    %c0_i32 = arith.constant 0 : i32
    %c0_i32_0 = arith.constant 0 : i32
    %c0_i32_1 = arith.constant 0 : i32
    return %c0_i32, %c0_i32_0 : i32, i32
  }
  func.func @transform_5(%arg0: i32) -> (i32, i32) {
    %c0_i32 = arith.constant 0 : i32
    %c0_i32_0 = arith.constant 0 : i32
    return %arg0, %c0_i32 : i32, i32
  }
}

</mosaic_0001>

<bundles_post_ra>
// kernel: tpu_custom_call.1
= control target key start
LH: loop header
LB: loop body
LE: loop exit
PB: predicated region body
PF: predicated region fallthrough
CT: control target
= control target key end

     0   :  { %10 = vsyncpa [#allocation3], 0  ;;  %s818_s0 = inlined_call_operand.hbm [shape: f32[16,128], index: 0, kind: input, shape index: {}]   ;;  %s819_s1 = inlined_call_operand.hbm [shape: bf16[128,256], index: 1, kind: input, shape index: {}]   ;;  %s820_s2 = inlined_call_operand.hbm [shape: f32[1,256], index: 2, kind: input, shape index: {}]   ;;  %s821_s3 = inlined_call_operand.hbm [shape: bf16[256,128], index: 3, kind: input, shape index: {}]   ;;  %s822_s4 = inlined_call_operand.hbm [shape: f32[1,128], index: 4, kind: input, shape index: {}]   ;;  %s823_s5 = inlined_call_operand.hbm [shape: f32[16,128], index: 5, kind: output, shape index: {}]  }
   0x1   :  { %11 = vsyncpa [#allocation6], 0 }
   0x2   :  { %12 = vsyncpa [#allocation9], 0 }
   0x3   :  { %13 = vsyncpa [#allocation4], 0  ;;  %s689_s18 = smov [#allocation5]   ;;  %s690_s20 = smov [#allocation8]  }
   0x4   :  { %s31_s19 = sshll.u32 %s689_s18, 4  ;;  %s53_s21 = sshll.u32 %s690_s20, 4  ;;  %s32_s19 = int_to_ptr.vmem [resolvable:$true] %s31_s19  ;;  %s730_s21 = int_to_ptr.vmem [resolvable:$true] %s53_s21 }
   0x5   :  { %s549_s24 = scalar_lea.hbm %s819_s1, 2048 }
   0x6   :  { %p550_p0 = scmp.ne.s32.totalorder %s819_s1, %s549_s24  ;;  %p553_p1 = scmp.lt.u32.totalorder %s549_s24, %s819_s1 }
   0x8   :  { %p555_p2 = pnand %p553_p1, %p550_p0 }
   0xa   :  { %558 = shalt.err (!%p555_p2)
}
   0xb   :  { %s559_s29 = scalar_lea.vmem %s32_s19, 2048  ;;  %p564_p4 = scmp.lt.s32.totalorder %s32_s19, %s32_s19 }
   0xc   :  { %p560_p3 = scmp.ne.s32.totalorder %s32_s19, %s559_s29  ;;  %p565_p5 = scmp.lt.s32.totalorder %s559_s29, %s559_s29 }
   0xe   :  { %p566_p6 = por %p565_p5, %p564_p4 }
  0x10   :  { %p567_p7 = pnand %p566_p6, %p560_p3 }
  0x12   :  { %570 = shalt.err (!%p567_p7)
}
  0x13   :  { %s691_s30 = smov 128   ;;  %s692_s6 = smov 8  }
  0x14   :  { %37 = dma.hbm_to_vmem [thread:$0]  %s819_s1, 2048, %s32_s19, [#allocation6], %s691_s30, %s691_s30, %s692_s6  }
  0x15   :  { %s571_s11 = scalar_lea.hbm %s821_s3, 2048 }
  0x16   :  { %p572_p8 = scmp.ne.s32.totalorder %s821_s3, %s571_s11  ;;  %p575_p9 = scmp.lt.u32.totalorder %s571_s11, %s821_s3 }
  0x18   :  { %p577_p10 = pnand %p575_p9, %p572_p8 }
  0x1a   :  { %580 = shalt.err (!%p577_p10)
}
  0x1b   :  { %s581_s16 = scalar_lea.vmem %s730_s21, 2048  ;;  %p586_p12 = scmp.lt.s32.totalorder %s730_s21, %s730_s21 }
  0x1c   :  { %p582_p11 = scmp.ne.s32.totalorder %s730_s21, %s581_s16  ;;  %p587_p13 = scmp.lt.s32.totalorder %s581_s16, %s581_s16 }
  0x1e   :  { %p588_p0 = por %p587_p13, %p586_p12 }
  0x20   :  { %p589_p1 = pnand %p588_p0, %p582_p11 }
  0x22   :  { %592 = shalt.err (!%p589_p1)
}
  0x23   :  { %s693_s1 = smov 64   ;;  %s694_s17 = smov 4  }
  0x24   :  { %59 = dma.hbm_to_vmem [thread:$0]  %s821_s3, 2048, %s730_s21, [#allocation9], %s693_s1, %s693_s1, %s694_s17  }
  0x25   :  { %s695_s20 = smov [#allocation2]   ;;  %s696_s23 = smov [#allocation7]  }
  0x26   :  { %s19_s22 = sshll.u32 %s695_s20, 4  ;;  %s44_s24 = sshll.u32 %s696_s23, 4  ;;  %s20_s22 = int_to_ptr.vmem [resolvable:$true] %s19_s22  ;;  %s45_s24 = int_to_ptr.vmem [resolvable:$true] %s44_s24 }
  0x27   :  { %s593_s27 = scalar_lea.hbm %s818_s0, 256 }
  0x28   :  { %p594_p2 = scmp.ne.s32.totalorder %s818_s0, %s593_s27  ;;  %p597_p3 = scmp.lt.u32.totalorder %s593_s27, %s818_s0 }
  0x2a   :  { %p599_p4 = pnand %p597_p3, %p594_p2 }
  0x2c   :  { %602 = shalt.err (!%p599_p4)
}
  0x2d   :  { %s603_s3 = scalar_lea.vmem %s20_s22, 256  ;;  %p608_p6 = scmp.lt.s32.totalorder %s20_s22, %s20_s22 }
  0x2e   :  { %p604_p5 = scmp.ne.s32.totalorder %s20_s22, %s603_s3  ;;  %p609_p7 = scmp.lt.s32.totalorder %s603_s3, %s603_s3 }
  0x30   :  { %p610_p8 = por %p609_p7, %p608_p6 }
  0x32   :  { %p611_p9 = pnand %p610_p8, %p604_p5 }
  0x34   :  { %614 = shalt.err (!%p611_p9)
}
  0x35   :  { %25 = dma.hbm_to_vmem [thread:$0]  %s818_s0, 256, %s20_s22, [#allocation3], %s691_s30, %s691_s30, %s692_s6  }
  0x36   :  { %s615_s12 = scalar_lea.hbm %s820_s2, 32 }
  0x37   :  { %p616_p10 = scmp.ne.s32.totalorder %s820_s2, %s615_s12  ;;  %p619_p11 = scmp.lt.u32.totalorder %s615_s12, %s820_s2 }
  0x39   :  { %p621_p12 = pnand %p619_p11, %p616_p10 }
  0x3b   :  { %624 = shalt.err (!%p621_p12)
}
  0x3c   :  { %s625_s1 = scalar_lea.vmem %s45_s24, 32  ;;  %p630_p0 = scmp.lt.s32.totalorder %s45_s24, %s45_s24 }
  0x3d   :  { %p626_p13 = scmp.ne.s32.totalorder %s45_s24, %s625_s1  ;;  %p631_p1 = scmp.lt.s32.totalorder %s625_s1, %s625_s1 }
  0x3f   :  { %p632_p2 = por %p631_p1, %p630_p0 }
  0x41   :  { %p633_p3 = pnand %p632_p2, %p626_p13 }
  0x43   :  { %636 = shalt.err (!%p633_p3)
}
  0x44   :  { %47 = dma.hbm_to_vmem [thread:$0]  %s820_s2, 32, %s45_s24, [#allocation6]  }
  0x45   :  { %s697_s18 = smov [#allocation10]   ;;  %s637_s23 = scalar_lea.hbm %s822_s4, 16 }
  0x46   :  { %s66_s19 = sshll.u32 %s697_s18, 4  ;;  %p638_p4 = scmp.ne.s32.totalorder %s822_s4, %s637_s23  ;;  %s67_s19 = int_to_ptr.vmem [resolvable:$true] %s66_s19 }
  0x47   :  { %p641_p5 = scmp.lt.u32.totalorder %s637_s23, %s822_s4 }
  0x49   :  { %p643_p6 = pnand %p641_p5, %p638_p4 }
  0x4b   :  { %646 = shalt.err (!%p643_p6)
}
  0x4c   :  { %s647_s29 = scalar_lea.vmem %s67_s19, 16  ;;  %s651_s2 = scalar_lea.vmem %s67_s19, 32 }
  0x4d   :  { %p648_p7 = scmp.ne.s32.totalorder %s67_s19, %s647_s29  ;;  %p652_p8 = scmp.lt.s32.totalorder %s67_s19, %s67_s19 }
  0x4e   :  { %p653_p9 = scmp.lt.s32.totalorder %s651_s2, %s647_s29 }
  0x50   :  { %p654_p10 = por %p653_p9, %p652_p8 }
  0x52   :  { %p655_p11 = pnand %p654_p10, %p648_p7 }
  0x54   :  { %658 = shalt.err (!%p655_p11)
}
  0x55   :  { %69 = dma.hbm_to_vmem [thread:$0]  %s822_s4, 16, %s67_s19, [#allocation9]  }
  0x56   :  { %681 = dma.done.wait [#allocation3], 256  }
  0x57   :  { %682 = vsyncadd [#allocation3], 4294967040 }
  0x58   :  { %683 = dma.done.wait [#allocation6], 2080  }
  0x59   :  { %684 = vsyncadd [#allocation6], 4294965216 }
  0x5a   :  { %685 = dma.done.wait [#allocation9], 2064  }
  0x5b   :  { %686 = vsyncadd [#allocation9], 4294965232  ;;  %v698_v0 = vmov 0   ;;  %v509_v1 = vld [vmem:[#allocation5 + $0x4] ss:$8 sps:$4 sm:$0xff]   ;;  %v537_v16 = vld [vmem:[#allocation8 + $0x50] sm:$0xff]   ;;  %v107_v36 = vlaneseq }
  0x5c   :  { %229 = vmatprep.mubr.bf16.mxu0 %v698_v0  ;;  %v511_v2 = vld [vmem:[#allocation5] ss:$8 sps:$4 sm:$0xff]   ;;  %197 = vmatprep.subr.bf16.mxu0 %v509_v1  ;;  %v512_v3 = vld [vmem:[#allocation5 + $0x14] ss:$8 sps:$4 sm:$0xff]   ;;  %v514_v4 = vld [vmem:[#allocation5 + $0x10] ss:$8 sps:$4 sm:$0xff]  }
  0x5d   :  { %198 = vmatpush1.bf16.msra.mxu0 %v511_v2  ;;  %v515_v5 = vld [vmem:[#allocation5 + $0x24] ss:$8 sps:$4 sm:$0xff]   ;;  %v517_v6 = vld [vmem:[#allocation5 + $0x20] ss:$8 sps:$4 sm:$0xff]   ;;  %v518_v7 = vld [vmem:[#allocation5 + $0x34] ss:$8 sps:$4 sm:$0xff]  }
  0x5e   :  { %199 = vmatprep.subr.bf16.mxu0 %v512_v3  ;;  %v520_v8 = vld [vmem:[#allocation5 + $0x30] ss:$8 sps:$4 sm:$0xff]   ;;  %v521_v9 = vld [vmem:[#allocation5 + $0x44] ss:$8 sps:$4 sm:$0xff]   ;;  %v523_v11 = vld [vmem:[#allocation5 + $0x40] ss:$8 sps:$4 sm:$0xff]  }
  0x5f   :  { %v533_v10 = vld [vmem:[#allocation8 + $0x40] sm:$0xff]   ;;  %v524_v13 = vld [vmem:[#allocation5 + $0x54] ss:$8 sps:$4 sm:$0xff]   ;;  %v535_v14 = vld [vmem:[#allocation8 + $0x48] sm:$0xff]   ;;  %v108_v37 = vshrl.u32 %v107_v36, 7  ;;  %s699_s4 = smov [#allocation11]  }
  0x60   :  { %v534_v12 = vld [vmem:[#allocation8] sm:$0xff]   ;;  %476 = vmatprep.subr.bf16.mxu1 %v533_v10  ;;  %v536_v15 = vld [vmem:[#allocation8 + $0x8] sm:$0xff]   ;;  %v538_v19 = vld [vmem:[#allocation8 + $0x10] sm:$0xff]   ;;  %s429_s8 = sshll.u32 %s699_s4, 4  ;;  %s430_s8 = int_to_ptr.vmem [resolvable:$true] %s429_s8 }
  0x61   :  { %200 = vmatpush1.bf16.msra.mxu0 %v514_v4  ;;  %477 = vmatpush3.bf16.msra.mxu1 %v534_v12  ;;  %v526_v17 = vld [vmem:[#allocation5 + $0x50] ss:$8 sps:$4 sm:$0xff]   ;;  %v527_v18 = vld [vmem:[#allocation5 + $0x64] ss:$8 sps:$4 sm:$0xff]   ;;  %v529_v21 = vld [vmem:[#allocation5 + $0x60] ss:$8 sps:$4 sm:$0xff]   ;;  %p664_p13 = scmp.lt.s32.totalorder %s430_s8, %s430_s8 }
  0x62   :  { %201 = vmatprep.subr.bf16.mxu0 %v515_v5  ;;  %478 = vmatprep.subr.bf16.mxu1 %v535_v14  ;;  %v539_v20 = vld [vmem:[#allocation8 + $0x58] sm:$0xff]   ;;  %v541_v24 = vld [vmem:[#allocation8 + $0x60] sm:$0xff]   ;;  %v86_v26 = vld [vmem:[#allocation2] sm:$0xff]  ;;  %v109_v38 = vsub.s32 0, %v108_v37  ;;  %v113_v40 = vsub.s32 1, %v108_v37  ;;  %s659_s3 = scalar_lea.vmem %s430_s8, 256 }
  0x63   :  { %v530_v22 = vld [vmem:[#allocation5 + $0x74] ss:$8 sps:$4 sm:$0xff]   ;;  %v532_v25 = vld [vmem:[#allocation5 + $0x70] ss:$8 sps:$4 sm:$0xff]   ;;  %v542_v28 = vld [vmem:[#allocation8 + $0x20] sm:$0xff]   ;;  %p660_p12 = scmp.ne.s32.totalorder %s430_s8, %s659_s3  ;;  %p665_p0 = scmp.lt.s32.totalorder %s659_s3, %s659_s3 }
  0x64   :  { %v540_v23 = vld [vmem:[#allocation8 + $0x18] sm:$0xff]   ;;  %v543_v29 = vld [vmem:[#allocation8 + $0x68] sm:$0xff]   ;;  %v545_v32 = vld [vmem:[#allocation8 + $0x70] sm:$0xff]  }
  0x65   :  { %202 = vmatpush1.bf16.msra.mxu0 %v517_v6  ;;  %479 = vmatpush3.bf16.msra.mxu1 %v536_v15  ;;  %v87_v27 = vld [vmem:[#allocation2 + $0x8] sm:$0xff]  ;;  %v544_v31 = vld [vmem:[#allocation8 + $0x28] sm:$0xff]   ;;  %v105_v39 = vld [vmem:[#allocation7] sm:$0x3]  ;;  %p666_p1 = por %p665_p0, %p664_p13 }
  0x66   :  { %203 = vmatprep.subr.bf16.mxu0 %v518_v7  ;;  %480 = vmatprep.subr.bf16.mxu1 %v537_v16  ;;  %v88_v30 = vpack.c.bf16 %v87_v27, %v86_v26  ;;  %v546_v33 = vld [vmem:[#allocation8 + $0x30] sm:$0xff]   ;;  %v547_v34 = vld [vmem:[#allocation8 + $0x78] sm:$0xff]   ;;  %v110_v41 = vrot.slane %v105_v39, %v109_v38  ;;  %v114_v42 = vrot.slane %v105_v39, %v113_v40  ;;  %v459_v58 = vld [vmem:[#allocation10] ss:$0 sm:$0xff] }
  0x67   :  { %v548_v35 = vld [vmem:[#allocation8 + $0x38] sm:$0xff]   ;;  %p667_p2 = pnand %p666_p1, %p660_p12 }
  0x69   :  { %204 = vmatpush1.bf16.msra.mxu0 %v520_v8  ;;  %481 = vmatpush3.bf16.msra.mxu1 %v538_v19 }
  0x6a   :  { %205 = vmatprep.subr.bf16.mxu0 %v521_v9  ;;  %482 = vmatprep.subr.bf16.mxu1 %v539_v20 }
  0x6d   :  { %206 = vmatpush1.bf16.msra.mxu0 %v523_v11  ;;  %483 = vmatpush3.bf16.msra.mxu1 %v540_v23 }
  0x6e   :  { %207 = vmatprep.subr.bf16.mxu0 %v524_v13  ;;  %484 = vmatprep.subr.bf16.mxu1 %v541_v24 }
  0x71   :  { %208 = vmatpush1.bf16.msra.mxu0 %v526_v17  ;;  %485 = vmatpush3.bf16.msra.mxu1 %v542_v28 }
  0x72   :  { %209 = vmatprep.subr.bf16.mxu0 %v527_v18  ;;  %486 = vmatprep.subr.bf16.mxu1 %v543_v29 }
  0x75   :  { %210 = vmatpush1.bf16.msra.mxu0 %v529_v21  ;;  %487 = vmatpush3.bf16.msra.mxu1 %v544_v31 }
  0x76   :  { %211 = vmatprep.subr.bf16.mxu0 %v530_v22  ;;  %488 = vmatprep.subr.bf16.mxu1 %v545_v32 }
  0x79   :  { %212 = vmatpush1.bf16.msra.mxu0 %v532_v25  ;;  %489 = vmatpush3.bf16.msra.mxu1 %v546_v33 }
  0x7a   :  { %490 = vmatprep.subr.bf16.mxu1 %v547_v34 }
  0x7c   :  { %230 = vmatmul.mubr.bf16.vlgmr.msra.gmra.mrb[0].mxu0 %v88_v30 }
  0x7d   :  { %491 = vmatpush3.bf16.msra.mxu1 %v548_v35 }
 0x14f   :  { %v231_v43 = vpop.f32.mrb[0].mxu0 }
 0x150   :  { %v232_v44 = vadd.f32 %v231_v43, %v110_v41  ;;  %v233_v45 = vpop.f32.mrb[1].mxu0 }
 0x151   :  { %v234_v46 = vadd.f32 %v233_v45, %v114_v42  ;;  %v235_v47 = vpop.f32.mrb[2].mxu0 }
 0x152   :  { %v236_v48 = vadd.f32 %v235_v47, %v110_v41  ;;  %v237_v49 = vpop.f32.mrb[3].mxu0  ;;  %v240_v51 = vmax.f32 %v232_v44, 0.0 }
 0x153   :  { %v238_v50 = vadd.f32 %v237_v49, %v114_v42  ;;  %v241_v53 = vmax.f32 %v234_v46, 0.0 }
 0x154   :  { %v242_v52 = vmax.f32 %v236_v48, 0.0 }
 0x155   :  { %v243_v54 = vmax.f32 %v238_v50, 0.0 }
 0x156   :  { %v244_v55 = vpack.c.bf16 %v242_v52, %v240_v51 }
 0x157   :  { %v245_v56 = vpack.c.bf16 %v243_v54, %v241_v53 }
 0x159   :  { %413 = vmatprep.mubr.bf16.mxu1 %v245_v56 }
 0x15a   :  { %414 = vmatmul.mubr.bf16.vlgmr.msra.gmra.mrb[0].mxu1 %v244_v55 }
 0x22d   :  { %v492_v57 = vpop.f32.mrb[0].mxu1 }
 0x22e   :  { %v493_v59 = vpop.f32.mrb[1].mxu1 }
 0x22f   :  { %v494_v60 = vadd.f32 %v493_v59, %v492_v57  ;;  %v495_v61 = vpop.f32.mrb[2].mxu1 }
 0x230   :  { %v496_v62 = vpop.f32.mrb[3].mxu1 }
 0x231   :  { %v416_v63 = vadd.f32 %v494_v60, %v459_v58  ;;  %v497_v0 = vadd.f32 %v496_v62, %v495_v61 }
 0x233   :  { %422 = vst [vmem:[#allocation11] sm:$0xff] %v416_v63  ;;  %v419_v1 = vadd.f32 %v497_v0, %v459_v58 }
 0x235   :  { %423 = vst [vmem:[#allocation11 + $0x8] sm:$0xff] %v419_v1 }
 0x236   :  { %670 = shalt.err (!%p667_p2)
}
 0x237   :  { %s671_s10 = scalar_lea.hbm %s823_s5, 256 }
 0x238   :  { %p672_p3 = scmp.ne.s32.totalorder %s823_s5, %s671_s10  ;;  %p675_p4 = scmp.lt.u32.totalorder %s671_s10, %s823_s5 }
 0x23a   :  { %p677_p5 = pnand %p675_p4, %p672_p3 }
 0x23c   :  { %680 = shalt.err (!%p677_p5)
}
 0x23d   :  { %435 = dma.vmem_to_hbm [thread:$0]  %s430_s8, 256, %s823_s5, [#allocation4], %s691_s30, %s691_s30, %s692_s6  }
 0x23e   :  { %687 = dma.done.wait [#allocation4], 256  }
 0x23f   :  { %688 = vsyncadd [#allocation4], 4294967040 }
 0x240   :  { %439 = vsyncpa [#allocation3], 1 }
 0x241   :  { %440 = vsyncpa [#allocation6], 1 }
 0x242   :  { %441 = vsyncpa [#allocation9], 1 }
 0x243   :  { %442 = vsyncpa [#allocation4], 1 }

</bundles_post_ra>
